<compile_context>
chip_gen: v6e
topology: v6e:2x2x1
jax: 0.10.0
libtpu: 0.0.40
codegen_flags: <defaults>
</compile_context>

<pallas_src>
import functools

import jax
import jax.numpy as jnp
from jax import lax
from jax.experimental import pallas as pl
from jax.experimental.pallas import tpu as pltpu


def _unit_kernel(x_ref, w1_ref, b1_ref, mask_ref, wdw_ref, w3_ref, b3_ref,
                 p1_ref, o_ref, *, W):
    """One batch element per grid step; channels on sublanes, H*W on lanes."""
    C, HW = x_ref.shape[1], x_ref.shape[2]
    bf = C // 2
    x = x_ref[0]                                       # (C, HW), lane-dense
    x1 = x[:bf, :]                                     # identity branch
    x2 = x[bf:, :]                                     # branch2 input

    # pre-act ReLU -> 1x1 conv (BN1 folded into weights) -> ReLU
    y = jnp.maximum(x2, 0.0)
    y = jnp.dot(w1_ref[...], y, preferred_element_type=jnp.float32) + b1_ref[...]
    y = jnp.maximum(y, 0.0)                            # (bf, HW)

    # depthwise 3x3, stride 1, pad 1: 8 static XLU lane-rolls + masked VPU FMAs.
    wdw = wdw_ref[...]                                 # (bf, 9), BN2 scale folded in
    mask = mask_ref[...]                               # (9, HW) boundary-validity masks
    acc = wdw[:, 4:5] * y                              # center tap: no shift, no mask
    t = 0
    for di in (-1, 0, 1):
        for dj in (-1, 0, 1):
            off = di * W + dj
            if off != 0:
                # shifted[:, p] == y[:, p + off]  (wrapped lanes get masked to 0)
                shifted = pltpu.roll(y, shift=(-off) % HW, axis=1)
                acc = acc + (wdw[:, t:t + 1] * mask[t:t + 1, :]) * shifted
            t += 1

    # last 1x1 conv with BN3 + b2 + channel_shuffle interleave folded into weights:
    #   out[2j]   = x1[j]                        (via P_even matmul)
    #   out[2j+1] = (W3s @ acc + b3_eff)[j]      (via pre-permuted W3 / folded bias)
    out = jnp.dot(w3_ref[...], acc, preferred_element_type=jnp.float32) + b3_ref[...]
    out = out + jnp.dot(p1_ref[...], x1, preferred_element_type=jnp.float32)
    o_ref[0] = out.astype(o_ref.dtype)


def inverted_residual_stride1(x_nchw, kparams):
    """Forward pass of InvertedResidual(inp, oup=inp, stride=1, pre_act=True)."""
    (w1s, b1c, mask9, wdw_s, w3p, b3_eff, p_even) = kparams
    B, C, H, W = x_nchw.shape
    HW = H * W
    x_flat = x_nchw.reshape(B, C, HW)                  # free reshape, stays NCHW

    x_spec = pl.BlockSpec((1, C, HW), lambda b: (b, 0, 0))

    def const2(arr):
        return pl.BlockSpec(arr.shape, lambda b: (0, 0))

    out_flat = pl.pallas_call(
        functools.partial(_unit_kernel, W=W),
        out_shape=jax.ShapeDtypeStruct((B, C, HW), x_nchw.dtype),
        grid=(B,),
        in_specs=[x_spec,
                  const2(w1s), const2(b1c), const2(mask9), const2(wdw_s),
                  const2(w3p), const2(b3_eff), const2(p_even)],
        out_specs=x_spec,
        compiler_params=pltpu.CompilerParams(dimension_semantics=("parallel",)),
    )(x_flat, w1s, b1c, mask9, wdw_s, w3p, b3_eff, p_even)
    return out_flat.reshape(B, C, H, W)


def make_raw_params(bf, key):
    """Deterministic synthetic PyTorch-shaped weights; BN folded to (scale, shift)."""
    eps = 1e-5
    ks = jax.random.split(key, 16)

    def bn(kg, kb, km, kv):
        g = 1.0 + 0.1 * jax.random.normal(kg, (bf,), jnp.float32)
        beta = 0.1 * jax.random.normal(kb, (bf,), jnp.float32)
        m = 0.1 * jax.random.normal(km, (bf,), jnp.float32)
        v = jax.random.uniform(kv, (bf,), jnp.float32, minval=0.5, maxval=1.5)
        s = g / jnp.sqrt(v + eps)
        b = beta - m * s
        return s, b

    w1 = 0.2 * jax.random.normal(ks[0], (bf, bf), jnp.float32)      # Conv2d(bf,bf,1)
    s1, b1 = bn(ks[1], ks[2], ks[3], ks[4])
    wdw = 0.2 * jax.random.normal(ks[5], (bf, 3, 3), jnp.float32)   # depthwise 3x3
    s2, b2 = bn(ks[6], ks[7], ks[8], ks[9])
    w3 = 0.2 * jax.random.normal(ks[10], (bf, bf), jnp.float32)     # Conv2d(bf,bf,1)
    s3, b3 = bn(ks[11], ks[12], ks[13], ks[14])
    return (w1, s1, b1, wdw, s2, b2, w3, s3, b3)


def fold_kernel_params(raw, H, W):
    """Fold BN into weights, b2 through conv3, and the channel shuffle into conv3."""
    (w1, s1, b1, wdw, s2, b2, w3, s3, b3) = raw
    bf = w1.shape[0]
    C = 2 * bf
    HW = H * W
    idx = jnp.arange(bf)
    p_even = jnp.zeros((C, bf), jnp.float32).at[2 * idx, idx].set(1.0)      # x1 -> even
    p_odd = jnp.zeros((C, bf), jnp.float32).at[2 * idx + 1, idx].set(1.0)   # y2 -> odd

    w1s = w1 * s1[:, None]                              # BN1 scale folded
    b1c = b1[:, None]
    wdw_s = (wdw * s2[:, None, None]).reshape(bf, 9)    # BN2 scale folded, tap-major
    w3p = p_odd @ (w3 * s3[:, None])                    # BN3 scale + shuffle folded
    b3_eff = w3p @ b2[:, None] + p_odd @ b3[:, None]    # b2 folded through conv3

    # per-tap boundary-validity masks for the 3x3, stride-1, pad-1 depthwise conv
    p = jnp.arange(HW)
    h, w = p // W, p % W
    masks = []
    for di in (-1, 0, 1):
        for dj in (-1, 0, 1):
            valid = (h + di >= 0) & (h + di < H) & (w + dj >= 0) & (w + dj < W)
            masks.append(valid.astype(jnp.float32))
    mask9 = jnp.stack(masks, axis=0)                    # (9, HW)
    return (w1s, b1c, mask9, wdw_s, w3p, b3_eff, p_even)


def _ref_forward(x_nchw, raw):
    """Pure-JAX reference of the full module forward (same folded-BN math)."""
    (w1, s1, b1, wdw, s2, b2, w3, s3, b3) = raw
    B, C, H, W = x_nchw.shape
    bf = C // 2
    hi = lax.Precision.HIGHEST
    x1, x2 = x_nchw[:, :bf], x_nchw[:, bf:]
    y = jnp.maximum(x2, 0.0)
    y = lax.conv_general_dilated(y, w1[:, :, None, None], (1, 1), 'VALID',
                                 dimension_numbers=('NCHW', 'OIHW', 'NCHW'),
                                 precision=hi)
    y = y * s1[None, :, None, None] + b1[None, :, None, None]
    y = jnp.maximum(y, 0.0)
    y = lax.conv_general_dilated(y, wdw[:, None, :, :], (1, 1), ((1, 1), (1, 1)),
                                 dimension_numbers=('NCHW', 'OIHW', 'NCHW'),
                                 feature_group_count=bf, precision=hi)
    y = y * s2[None, :, None, None] + b2[None, :, None, None]
    y = lax.conv_general_dilated(y, w3[:, :, None, None], (1, 1), 'VALID',
                                 dimension_numbers=('NCHW', 'OIHW', 'NCHW'),
                                 precision=hi)
    y = y * s3[None, :, None, None] + b3[None, :, None, None]
    out = jnp.concatenate([x1, y], axis=1)
    out = (out.reshape(B, 2, bf, H, W).transpose(0, 2, 1, 3, 4).reshape(B, C, H, W))
    return out


if __name__ == "__main__":
    key = jax.random.PRNGKey(0)
    kx, kp = jax.random.split(key)

    B, C, H, W = 2, 16, 16, 16          # inp == oup == 16, branch_features = 8
    bf = C // 2
    x = jax.random.normal(kx, (B, C, H, W), jnp.float32)

    raw = make_raw_params(bf, kp)
    kparams = fold_kernel_params(raw, H, W)

    out = jax.block_until_ready(inverted_residual_stride1(x, kparams))
    assert out.shape == (B, C, H, W)

    out_ref = _ref_forward(x, raw)
    assert jnp.allclose(out, out_ref, atol=1e-3, rtol=1e-3), "mismatch vs reference"

    print("KERNEL_OK")
</pallas_src>

<mosaic_0001>
module attributes {stable_mosaic.version = 11 : i64} {
  func.func @_unit_kernel(%arg0: i32, %arg1: memref<1x16x256xf32, #tpu.memory_space<vmem>>, %arg2: memref<8x8xf32, #tpu.memory_space<vmem>>, %arg3: memref<8x1xf32, #tpu.memory_space<vmem>>, %arg4: memref<9x256xf32, #tpu.memory_space<vmem>>, %arg5: memref<8x9xf32, #tpu.memory_space<vmem>>, %arg6: memref<16x8xf32, #tpu.memory_space<vmem>>, %arg7: memref<16x1xf32, #tpu.memory_space<vmem>>, %arg8: memref<16x8xf32, #tpu.memory_space<vmem>>, %arg9: memref<1x16x256xf32, #tpu.memory_space<vmem>>) attributes {dimension_semantics = [#tpu.dimension_semantics<parallel>], iteration_bounds = array<i64: 2>, scalar_prefetch = 0 : i64, scratch_operands = 0 : i64, tpu.core_type = #tpu.core_type<tc>, window_params = [{transform_indices = @transform_0, window_bounds = array<i64: 1, 16, 256>}, {pipeline_mode = #tpu.pipeline_mode<synchronous>, transform_indices = @transform_1, window_bounds = array<i64: 8, 8>}, {pipeline_mode = #tpu.pipeline_mode<synchronous>, transform_indices = @transform_2, window_bounds = array<i64: 8, 1>}, {pipeline_mode = #tpu.pipeline_mode<synchronous>, transform_indices = @transform_3, window_bounds = array<i64: 9, 256>}, {pipeline_mode = #tpu.pipeline_mode<synchronous>, transform_indices = @transform_4, window_bounds = array<i64: 8, 9>}, {pipeline_mode = #tpu.pipeline_mode<synchronous>, transform_indices = @transform_5, window_bounds = array<i64: 16, 8>}, {pipeline_mode = #tpu.pipeline_mode<synchronous>, transform_indices = @transform_6, window_bounds = array<i64: 16, 1>}, {pipeline_mode = #tpu.pipeline_mode<synchronous>, transform_indices = @transform_7, window_bounds = array<i64: 16, 8>}, {transform_indices = @transform_8, window_bounds = array<i64: 1, 16, 256>}]} {
    %c0 = arith.constant 0 : index
    %c0_0 = arith.constant 0 : index
    %c0_1 = arith.constant 0 : index
    %0 = vector.load %arg1[%c0, %c0_0, %c0_1] : memref<1x16x256xf32, #tpu.memory_space<vmem>>, vector<1x16x256xf32>
    %1 = vector.shape_cast %0 : vector<1x16x256xf32> to vector<16x256xf32>
    %2 = vector.extract_strided_slice %1 {offsets = [0, 0], sizes = [8, 256], strides = [1, 1]} : vector<16x256xf32> to vector<8x256xf32>
    %3 = vector.extract_strided_slice %1 {offsets = [8, 0], sizes = [8, 256], strides = [1, 1]} : vector<16x256xf32> to vector<8x256xf32>
    %cst = arith.constant 0.000000e+00 : f32
    %4 = vector.broadcast %cst : f32 to vector<8x256xf32>
    %5 = arith.maximumf %3, %4 : vector<8x256xf32>
    %c0_2 = arith.constant 0 : index
    %c0_3 = arith.constant 0 : index
    %6 = vector.load %arg2[%c0_2, %c0_3] : memref<8x8xf32, #tpu.memory_space<vmem>>, vector<8x8xf32>
    %cst_4 = arith.constant dense<0.000000e+00> : vector<8x256xf32>
    %7 = tpu.matmul %6, %5, %cst_4 {dimension_numbers = #tpu.dot_dimension_numbers<[1], [0], [0], [1], [0, 0, 1, 1], [], []>} : vector<8x8xf32>, vector<8x256xf32>, vector<8x256xf32> -> vector<8x256xf32>
    %c0_5 = arith.constant 0 : index
    %c0_6 = arith.constant 0 : index
    %8 = vector.load %arg3[%c0_5, %c0_6] : memref<8x1xf32, #tpu.memory_space<vmem>>, vector<8x1xf32>
    %9 = vector.broadcast %8 : vector<8x1xf32> to vector<8x256xf32>
    %10 = arith.addf %7, %9 : vector<8x256xf32>
    %cst_7 = arith.constant 0.000000e+00 : f32
    %11 = vector.broadcast %cst_7 : f32 to vector<8x256xf32>
    %12 = arith.maximumf %10, %11 : vector<8x256xf32>
    %c0_8 = arith.constant 0 : index
    %c0_9 = arith.constant 0 : index
    %13 = vector.load %arg5[%c0_8, %c0_9] : memref<8x9xf32, #tpu.memory_space<vmem>>, vector<8x9xf32>
    %c0_10 = arith.constant 0 : index
    %c0_11 = arith.constant 0 : index
    %14 = vector.load %arg4[%c0_10, %c0_11] : memref<9x256xf32, #tpu.memory_space<vmem>>, vector<9x256xf32>
    %15 = vector.extract_strided_slice %13 {offsets = [0, 4], sizes = [8, 1], strides = [1, 1]} : vector<8x9xf32> to vector<8x1xf32>
    %16 = vector.broadcast %15 : vector<8x1xf32> to vector<8x256xf32>
    %17 = arith.mulf %16, %12 : vector<8x256xf32>
    %c17_i32 = arith.constant 17 : i32
    %18 = tpu.dynamic_rotate %12 by %c17_i32 dim 1 : vector<8x256xf32>, i32 -> vector<8x256xf32>
    %19 = vector.extract_strided_slice %13 {offsets = [0, 0], sizes = [8, 1], strides = [1, 1]} : vector<8x9xf32> to vector<8x1xf32>
    %20 = vector.extract_strided_slice %14 {offsets = [0, 0], sizes = [1, 256], strides = [1, 1]} : vector<9x256xf32> to vector<1x256xf32>
    %21 = vector.broadcast %19 : vector<8x1xf32> to vector<8x256xf32>
    %22 = vector.broadcast %20 : vector<1x256xf32> to vector<8x256xf32>
    %23 = arith.mulf %21, %22 : vector<8x256xf32>
    %24 = arith.mulf %23, %18 : vector<8x256xf32>
    %25 = arith.addf %17, %24 : vector<8x256xf32>
    %c16_i32 = arith.constant 16 : i32
    %26 = tpu.dynamic_rotate %12 by %c16_i32 dim 1 : vector<8x256xf32>, i32 -> vector<8x256xf32>
    %27 = vector.extract_strided_slice %13 {offsets = [0, 1], sizes = [8, 1], strides = [1, 1]} : vector<8x9xf32> to vector<8x1xf32>
    %28 = vector.extract_strided_slice %14 {offsets = [1, 0], sizes = [1, 256], strides = [1, 1]} : vector<9x256xf32> to vector<1x256xf32>
    %29 = vector.broadcast %27 : vector<8x1xf32> to vector<8x256xf32>
    %30 = vector.broadcast %28 : vector<1x256xf32> to vector<8x256xf32>
    %31 = arith.mulf %29, %30 : vector<8x256xf32>
    %32 = arith.mulf %31, %26 : vector<8x256xf32>
    %33 = arith.addf %25, %32 : vector<8x256xf32>
    %c15_i32 = arith.constant 15 : i32
    %34 = tpu.dynamic_rotate %12 by %c15_i32 dim 1 : vector<8x256xf32>, i32 -> vector<8x256xf32>
    %35 = vector.extract_strided_slice %13 {offsets = [0, 2], sizes = [8, 1], strides = [1, 1]} : vector<8x9xf32> to vector<8x1xf32>
    %36 = vector.extract_strided_slice %14 {offsets = [2, 0], sizes = [1, 256], strides = [1, 1]} : vector<9x256xf32> to vector<1x256xf32>
    %37 = vector.broadcast %35 : vector<8x1xf32> to vector<8x256xf32>
    %38 = vector.broadcast %36 : vector<1x256xf32> to vector<8x256xf32>
    %39 = arith.mulf %37, %38 : vector<8x256xf32>
    %40 = arith.mulf %39, %34 : vector<8x256xf32>
    %41 = arith.addf %33, %40 : vector<8x256xf32>
    %c1_i32 = arith.constant 1 : i32
    %42 = tpu.dynamic_rotate %12 by %c1_i32 dim 1 : vector<8x256xf32>, i32 -> vector<8x256xf32>
    %43 = vector.extract_strided_slice %13 {offsets = [0, 3], sizes = [8, 1], strides = [1, 1]} : vector<8x9xf32> to vector<8x1xf32>
    %44 = vector.extract_strided_slice %14 {offsets = [3, 0], sizes = [1, 256], strides = [1, 1]} : vector<9x256xf32> to vector<1x256xf32>
    %45 = vector.broadcast %43 : vector<8x1xf32> to vector<8x256xf32>
    %46 = vector.broadcast %44 : vector<1x256xf32> to vector<8x256xf32>
    %47 = arith.mulf %45, %46 : vector<8x256xf32>
    %48 = arith.mulf %47, %42 : vector<8x256xf32>
    %49 = arith.addf %41, %48 : vector<8x256xf32>
    %c255_i32 = arith.constant 255 : i32
    %50 = tpu.dynamic_rotate %12 by %c255_i32 dim 1 : vector<8x256xf32>, i32 -> vector<8x256xf32>
    %51 = vector.extract_strided_slice %13 {offsets = [0, 5], sizes = [8, 1], strides = [1, 1]} : vector<8x9xf32> to vector<8x1xf32>
    %52 = vector.extract_strided_slice %14 {offsets = [5, 0], sizes = [1, 256], strides = [1, 1]} : vector<9x256xf32> to vector<1x256xf32>
    %53 = vector.broadcast %51 : vector<8x1xf32> to vector<8x256xf32>
    %54 = vector.broadcast %52 : vector<1x256xf32> to vector<8x256xf32>
    %55 = arith.mulf %53, %54 : vector<8x256xf32>
    %56 = arith.mulf %55, %50 : vector<8x256xf32>
    %57 = arith.addf %49, %56 : vector<8x256xf32>
    %c241_i32 = arith.constant 241 : i32
    %58 = tpu.dynamic_rotate %12 by %c241_i32 dim 1 : vector<8x256xf32>, i32 -> vector<8x256xf32>
    %59 = vector.extract_strided_slice %13 {offsets = [0, 6], sizes = [8, 1], strides = [1, 1]} : vector<8x9xf32> to vector<8x1xf32>
    %60 = vector.extract_strided_slice %14 {offsets = [6, 0], sizes = [1, 256], strides = [1, 1]} : vector<9x256xf32> to vector<1x256xf32>
    %61 = vector.broadcast %59 : vector<8x1xf32> to vector<8x256xf32>
    %62 = vector.broadcast %60 : vector<1x256xf32> to vector<8x256xf32>
    %63 = arith.mulf %61, %62 : vector<8x256xf32>
    %64 = arith.mulf %63, %58 : vector<8x256xf32>
    %65 = arith.addf %57, %64 : vector<8x256xf32>
    %c240_i32 = arith.constant 240 : i32
    %66 = tpu.dynamic_rotate %12 by %c240_i32 dim 1 : vector<8x256xf32>, i32 -> vector<8x256xf32>
    %67 = vector.extract_strided_slice %13 {offsets = [0, 7], sizes = [8, 1], strides = [1, 1]} : vector<8x9xf32> to vector<8x1xf32>
    %68 = vector.extract_strided_slice %14 {offsets = [7, 0], sizes = [1, 256], strides = [1, 1]} : vector<9x256xf32> to vector<1x256xf32>
    %69 = vector.broadcast %67 : vector<8x1xf32> to vector<8x256xf32>
    %70 = vector.broadcast %68 : vector<1x256xf32> to vector<8x256xf32>
    %71 = arith.mulf %69, %70 : vector<8x256xf32>
    %72 = arith.mulf %71, %66 : vector<8x256xf32>
    %73 = arith.addf %65, %72 : vector<8x256xf32>
    %c239_i32 = arith.constant 239 : i32
    %74 = tpu.dynamic_rotate %12 by %c239_i32 dim 1 : vector<8x256xf32>, i32 -> vector<8x256xf32>
    %75 = vector.extract_strided_slice %13 {offsets = [0, 8], sizes = [8, 1], strides = [1, 1]} : vector<8x9xf32> to vector<8x1xf32>
    %76 = vector.extract_strided_slice %14 {offsets = [8, 0], sizes = [1, 256], strides = [1, 1]} : vector<9x256xf32> to vector<1x256xf32>
    %77 = vector.broadcast %75 : vector<8x1xf32> to vector<8x256xf32>
    %78 = vector.broadcast %76 : vector<1x256xf32> to vector<8x256xf32>
    %79 = arith.mulf %77, %78 : vector<8x256xf32>
    %80 = arith.mulf %79, %74 : vector<8x256xf32>
    %81 = arith.addf %73, %80 : vector<8x256xf32>
    %c0_12 = arith.constant 0 : index
    %c0_13 = arith.constant 0 : index
    %82 = vector.load %arg6[%c0_12, %c0_13] : memref<16x8xf32, #tpu.memory_space<vmem>>, vector<16x8xf32>
    %cst_14 = arith.constant dense<0.000000e+00> : vector<16x256xf32>
    %83 = tpu.matmul %82, %81, %cst_14 {dimension_numbers = #tpu.dot_dimension_numbers<[1], [0], [0], [1], [0, 0, 1, 1], [], []>} : vector<16x8xf32>, vector<8x256xf32>, vector<16x256xf32> -> vector<16x256xf32>
    %c0_15 = arith.constant 0 : index
    %c0_16 = arith.constant 0 : index
    %84 = vector.load %arg7[%c0_15, %c0_16] : memref<16x1xf32, #tpu.memory_space<vmem>>, vector<16x1xf32>
    %85 = vector.broadcast %84 : vector<16x1xf32> to vector<16x256xf32>
    %86 = arith.addf %83, %85 : vector<16x256xf32>
    %c0_17 = arith.constant 0 : index
    %c0_18 = arith.constant 0 : index
    %87 = vector.load %arg8[%c0_17, %c0_18] : memref<16x8xf32, #tpu.memory_space<vmem>>, vector<16x8xf32>
    %cst_19 = arith.constant dense<0.000000e+00> : vector<16x256xf32>
    %88 = tpu.matmul %87, %2, %cst_19 {dimension_numbers = #tpu.dot_dimension_numbers<[1], [0], [0], [1], [0, 0, 1, 1], [], []>} : vector<16x8xf32>, vector<8x256xf32>, vector<16x256xf32> -> vector<16x256xf32>
    %89 = arith.addf %86, %88 : vector<16x256xf32>
    %c0_20 = arith.constant 0 : index
    %c0_21 = arith.constant 0 : index
    %c0_22 = arith.constant 0 : index
    %90 = vector.load %arg9[%c0_20, %c0_21, %c0_22] : memref<1x16x256xf32, #tpu.memory_space<vmem>>, vector<1x16x256xf32>
    %91 = vector.shape_cast %90 : vector<1x16x256xf32> to vector<16x256xf32>
    %92 = vector.shape_cast %89 : vector<16x256xf32> to vector<1x16x256xf32>
    tpu.vector_store %arg9[%c0_20, %c0_21, %c0_22], %92 {strides = array<i32>} : memref<1x16x256xf32, #tpu.memory_space<vmem>>, vector<1x16x256xf32>,
    return
  }
  func.func @transform_0(%arg0: i32) -> (i32, i32, i32) {
    %c0_i32 = arith.constant 0 : i32
    %c0_i32_0 = arith.constant 0 : i32
    %c0_i32_1 = arith.constant 0 : i32
    return %arg0, %c0_i32, %c0_i32_0 : i32, i32, i32
  }
  func.func @transform_1(%arg0: i32) -> (i32, i32) {
    %c0_i32 = arith.constant 0 : i32
    %c0_i32_0 = arith.constant 0 : i32
    %c0_i32_1 = arith.constant 0 : i32
    return %c0_i32, %c0_i32_0 : i32, i32
  }
  func.func @transform_2(%arg0: i32) -> (i32, i32) {
    %c0_i32 = arith.constant 0 : i32
    %c0_i32_0 = arith.constant 0 : i32
    %c0_i32_1 = arith.constant 0 : i32
    return %c0_i32, %c0_i32_0 : i32, i32
  }
  func.func @transform_3(%arg0: i32) -> (i32, i32) {
    %c0_i32 = arith.constant 0 : i32
    %c0_i32_0 = arith.constant 0 : i32
    %c0_i32_1 = arith.constant 0 : i32
    return %c0_i32, %c0_i32_0 : i32, i32
  }
  func.func @transform_4(%arg0: i32) -> (i32, i32) {
    %c0_i32 = arith.constant 0 : i32
    %c0_i32_0 = arith.constant 0 : i32
    %c0_i32_1 = arith.constant 0 : i32
    return %c0_i32, %c0_i32_0 : i32, i32
  }
  func.func @transform_5(%arg0: i32) -> (i32, i32) {
    %c0_i32 = arith.constant 0 : i32
    %c0_i32_0 = arith.constant 0 : i32
    %c0_i32_1 = arith.constant 0 : i32
    return %c0_i32, %c0_i32_0 : i32, i32
  }
  func.func @transform_6(%arg0: i32) -> (i32, i32) {
    %c0_i32 = arith.constant 0 : i32
    %c0_i32_0 = arith.constant 0 : i32
    %c0_i32_1 = arith.constant 0 : i32
    return %c0_i32, %c0_i32_0 : i32, i32
  }
  func.func @transform_7(%arg0: i32) -> (i32, i32) {
    %c0_i32 = arith.constant 0 : i32
    %c0_i32_0 = arith.constant 0 : i32
    %c0_i32_1 = arith.constant 0 : i32
    return %c0_i32, %c0_i32_0 : i32, i32
  }
  func.func @transform_8(%arg0: i32) -> (i32, i32, i32) {
    %c0_i32 = arith.constant 0 : i32
    %c0_i32_0 = arith.constant 0 : i32
    %c0_i32_1 = arith.constant 0 : i32
    return %arg0, %c0_i32, %c0_i32_0 : i32, i32, i32
  }
}

</mosaic_0001>

<bundles_post_ra>
// kernel: tpu_custom_call.1
= control target key start
LH: loop header
LB: loop body
LE: loop exit
PB: predicated region body
PF: predicated region fallthrough
CT: control target
= control target key end

     0   :  { %13 = vsyncpa [#allocation3], 0  ;;  %s1551_s0 = inlined_call_operand.vmem [shape: f32[2,16,256], index: 0, kind: input, shape index: {}]   ;;  %s1552_s1 = inlined_call_operand.hbm [shape: f32[8,8], index: 1, kind: input, shape index: {}]   ;;  %s1553_s2 = inlined_call_operand.vmem [shape: f32[8,1], index: 2, kind: input, shape index: {}]   ;;  %s1554_s3 = inlined_call_operand.hbm [shape: f32[9,256], index: 3, kind: input, shape index: {}]   ;;  %s1555_s4 = inlined_call_operand.hbm [shape: f32[8,9], index: 4, kind: input, shape index: {}]   ;;  %s1556_s5 = inlined_call_operand.vmem [shape: f32[16,8], index: 5, kind: input, shape index: {}]   ;;  %s1557_s6 = inlined_call_operand.vmem [shape: f32[16,1], index: 6, kind: input, shape index: {}]   ;;  %s1558_s7 = inlined_call_operand.vmem [shape: f32[16,8], index: 7, kind: input, shape index: {}]   ;;  %s1559_s8 = inlined_call_operand.hbm [shape: f32[2,16,256], index: 8, kind: output, shape index: {}]  }
   0x1   :  { %14 = vsyncpa [#allocation6], 0 }
   0x2   :  { %15 = vsyncpa [#allocation4], 0 }
   0x3   :  { %17 = vsyncpa [#allocation4 + $0x1], 0  ;;  %s1292_s27 = smov 0   ;;  %s1294_s28 = smov 0  }
   0x4   :  { %s1296_s29 = smov 0   ;;  %s1298_s30 = smov 0  }
   0x5 LB: > { %s1313_s9 = sadd.s32 4294967295, %s1220_s30   ;;  %s945_s10 = sadd.s32 4294967294, %s1220_s30   ;;  %s1220_s30 = sphi %s1298_s30, %s1575_s30   ;;  %s1216_s29 = sphi %s1296_s29, %s1574_s29   ;;  %s1212_s28 = sphi %s1294_s28, %s1573_s28   ;;  %s1208_s27 = sphi %s1292_s27, %s1572_s27  }
   0x6   : > { %s1317_s11 = sadd.s32 1, %s1220_s30   ;;  %s203_s12 = sadd.s32 1, %s1216_s29 }
   0x7   : > { %s200_s13 = ssub.s32 %s1220_s30, %s1317_s11  ;;  %p213_p0 = scmp.ne.s32.totalorder %s1216_s29, %s1212_s28 }
   0x8   : > { %p201_p1 = scmp.eq.s32.totalorder %s200_s13, 0  ;;  %p214_p2 = scmp.eq.s32.totalorder %s1313_s9, 1 }
   0x9   : > { %p219_p3 = scmp.ne.s32.totalorder %s1212_s28, %s1208_s27  ;;  %p220_p4 = scmp.eq.s32.totalorder %s945_s10, 1 }
   0xa   : > { %s1328_s14 = scalar_select %p201_p1, %s1216_s29, %s203_s12  }
   0xb   : > { %p1330_p5 = por %p214_p2, %p213_p0  ;;  %p1334_p6 = por %p220_p4, %p219_p3 }
   0xc   : > { %p946_p7 = scmp.ge.s32.totalorder %s1220_s30, 1  ;;  %p227_p8 = scmp.lt.s32.totalorder %s1220_s30, 3 }
   0xd   : > { %s1562_s15 = scalar_select %p1330_p5, 1, 0 }
   0xe   : > { %s1563_s16 = scalar_select %p1334_p6, 1, 0 }
   0xf   : > { %p1560_p9 = scmp.eq.s32.totalorder %s1313_s9, 0  ;;  %p1341_p10 = pnand %p946_p7, %p227_p8 }
  0x10   : > { %s1222_s18 = smov [#allocation5]   ;;  %s1223_s21 = smov [#allocation2]  }
  0x11   : > { %s253_s19 = sshll.u32 %s1222_s18, 4  ;;  %p986_p11 = pneg %p1341_p10  ;;  %s254_s19 = int_to_ptr.vmem [resolvable:$true] %s253_s19 }
  0x12   : > { %s240_s22 = sshll.u32 %s1223_s21, 4  ;;  %s1224_s23 = smov [#allocation7]   ;;  %s241_s22 = int_to_ptr.vmem [resolvable:$true] %s240_s22 }
  0x13   : > { %p1349_p12 = pnand %p1560_p9, %p986_p11  ;;  %s267_s24 = sshll.u32 %s1224_s23, 4  ;;  %s268_s24 = int_to_ptr.vmem [resolvable:$true] %s267_s24 }
  0x14   : > { %s1085_s25 = scalar_lea.vmem %s254_s19, 512  ;;  %p1093_p3 = scmp.lt.s32.totalorder %s254_s19, %s254_s19 }
  0x15   : > { %p1076_p13 = pneg %p1349_p12  ;;  %p1086_p0 = scmp.ne.s32.totalorder %s254_s19, %s1085_s25 }
  0x16   : > { %p1094_p4 = scmp.lt.s32.totalorder %s1085_s25, %s1085_s25 }
  0x17   : > { %p1088_p1 = pnand %p1086_p0, %p1076_p13 }
  0x18   : > { %p1095_p7 = por %p1094_p4, %p1093_p3 }
  0x19   : > { %p1089_p2 = pneg %p1088_p1 }
  0x1b   : > { %p1096_p8 = pnand %p1095_p7, %p1089_p2 }
  0x1d   : > { %1099 = shalt.err (!%p1096_p8)
}
  0x1e   : > { %s1225_s26 = smov 256   ;;  %s1226_s10 = smov 16  }
  0x1f   : > { %992 = dma.hbm_to_vmem [thread:$0]  (!%p1349_p12), %s1554_s3, 512, %s254_s19, [#allocation6], %s1225_s26, %s1225_s26, %s1226_s10  }
  0x20   : > { %s1111_s18 = scalar_lea.vmem %s241_s22, 128  ;;  %p1119_p9 = scmp.lt.s32.totalorder %s241_s22, %s241_s22 }
  0x21   : > { %p1112_p11 = scmp.ne.s32.totalorder %s241_s22, %s1111_s18  ;;  %p1120_p6 = scmp.lt.s32.totalorder %s1111_s18, %s1111_s18 }
  0x23   : > { %p1114_p0 = pnand %p1112_p11, %p1076_p13  ;;  %p1121_p3 = por %p1120_p6, %p1119_p9 }
  0x25   : > { %p1115_p1 = pneg %p1114_p0 }
  0x27   : > { %p1122_p2 = pnand %p1121_p3, %p1115_p1 }
  0x29   : > { %1125 = shalt.err (!%p1122_p2)
}
  0x2a   : > { %989 = dma.hbm_to_vmem [thread:$0]  (!%p1349_p12), %s1552_s1, 128, %s241_s22, [#allocation3]  }
  0x2b   : > { %s1137_s19 = scalar_lea.vmem %s268_s24, 128  ;;  %p1145_p11 = scmp.lt.s32.totalorder %s268_s24, %s268_s24 }
  0x2c   : > { %p1138_p4 = scmp.ne.s32.totalorder %s268_s24, %s1137_s19  ;;  %p1146_p0 = scmp.lt.s32.totalorder %s1137_s19, %s1137_s19 }
  0x2e   : > { %p1140_p7 = pnand %p1138_p4, %p1076_p13  ;;  %p1147_p5 = por %p1146_p0, %p1145_p11 }
  0x30   : > { %p1141_p8 = pneg %p1140_p7 }
  0x32   : > { %p1148_p6 = pnand %p1147_p5, %p1141_p8 }
  0x34   : > { %1151 = shalt.err (!%p1148_p6)
}
  0x35   : > { %995 = dma.hbm_to_vmem [thread:$0]  (!%p1349_p12), %s1555_s4, 128, %s268_s24, [#allocation6]  }
  0x36   : > { %297 = sbr.rel (%p1341_p10) target bundleno = 662 (0x296), region = 52  ;;  %p1566_p9 = scmp.eq.s32.totalorder (!%p1341_p10), %s1313_s9, 0 }
  0x3b   : > { %1195 = dma.done.wait (%p1566_p9), [#allocation3], 128   ;;  %p1567_p13 = pmov %p1566_p9 }
  0x3c   : > { %p1568_p1 = pmov %p1566_p9 }
  0x3d   : > { %1197 = vsyncadd (%p1567_p13), [#allocation3], 4294967168 }
  0x3e   : > { %1199 = dma.done.wait (%p1568_p1), [#allocation6], 640   ;;  %p1569_p5 = pmov %p1568_p1 }
  0x3f   : > { %p339_p3 = scmp.lt.s32.totalorder %s1313_s9, 1  ;;  %v1227_v0 = vmov 0.0   ;;  %v1228_v1 = vmov 0   ;;  %v1229_v2 = vmov 4   ;;  %v351_v7 = vld [vmem:[%s1553_s2] sm:$0xff]  ;;  %v434_v8 = vld [vmem:[#allocation7] sm:$0xff]  ;;  %v450_v40 = vlaneseq }
  0x40   : > { %1201 = vsyncadd (%p1569_p5), [#allocation6], 4294966656  ;;  %425 = vmatprep.mubr.f32.mxu0 %v1227_v0  ;;  %1063 = vset.pattern.permute.xlu0 %v1228_v1  ;;  %v350_v9 = vld [vmem:[#allocation2] sm:$0xff]  ;;  %vm357_vm0 = vcmask 64512   ;;  %v1230_v10 = vmov 1   ;;  %v1231_v11 = vmov 2  }
  0x41   : > { %s340_s17 = scalar_select %p339_p3, %s1313_s9, 1  ;;  %1064 = vset.pattern.permute.xlu1 %v1229_v2  ;;  %732 = vmatprep.mubr.f32.mxu1 %v1227_v0  ;;  %v1232_v12 = vmov 3   ;;  %v1233_v13 = vmov 5   ;;  %v1234_v14 = vmov 6   ;;  %v1235_v15 = vmov 7   ;;  %v745_v26 = vld [vmem:[%s1558_s7] sm:$0xff] }
  0x42   : > { %354 = vperm.xlu0 %1063, %v351_v7   ;;  %441 = vperm.xlu1 %1064, %v434_v8   ;;  %v1236_v16 = vmov 8   ;;  %s1237_s18 = smov 112   ;;  %s1238_s21 = smov 17   ;;  %v746_v27 = vld [vmem:[%s1558_s7 + $0x8] sm:$0xff]  ;;  %v650_v28 = vld [vmem:[%s1557_s6] sm:$0xff]  ;;  %v460_v42 = vshrl.u32 %v450_v40, 7 }
  0x43   : > { %s970_s20 = sshll.u32 %s340_s17, 5  ;;  %s1239_s23 = smov 111   ;;  %v651_v29 = vld [vmem:[%s1557_s6 + $0x8] sm:$0xff]  ;;  %v436_v48 = vld [vmem:[#allocation5 + $0x8] sm:$0xff]  ;;  %v1458_v49 = vand.u32 127, %v450_v40 }
  0x44   : > { %s1396_s10 = scalar_lea.vmem %s1551_s0, %s970_s20  ;;  %s1240_s19 = smov 16   ;;  %v461_v45 = vsub.s32 0, %v460_v42  ;;  %v435_v46 = vld [vmem:[#allocation5] sm:$0xff]  ;;  %v511_v47 = vsub.s32 2, %v460_v42  ;;  %v486_v51 = vsub.s32 1, %v460_v42  ;;  %v536_v53 = vsub.s32 3, %v460_v42 }
  0x45   : > { %v347_v3 = vld [vmem:[%s1396_s10 + $0x18] sm:$0xff]  ;;  %v346_v4 = vld [vmem:[%s1396_s10 + $0x10] sm:$0xff]  ;;  %s1241_s25 = smov 15   ;;  %s1242_s26 = smov 1   ;;  %v345_v24 = vld [vmem:[%s1396_s10 + $0x8] sm:$0xff]  ;;  %v561_v54 = vsub.s32 5, %v460_v42 }
  0x46   : > { %v349_v5 = vmax.f32 %v347_v3, 0.0  ;;  %v348_v6 = vmax.f32 %v346_v4, 0.0  ;;  %456 = vperm.xlu0 %1063, %v434_v8   ;;  %1065 = vset.pattern.permute.xlu1 %v1230_v10  ;;  %s1243_s17 = smov 127   ;;  %s1244_s20 = smov 113   ;;  %v344_v25 = vld [vmem:[%s1396_s10] sm:$0xff]  ;;  %v462_v55 = vrot.slane %v435_v46, %v461_v45  ;;  %v586_v56 = vsub.s32 6, %v460_v42 }
  0x47   : > { %481 = vperm.xlu1 %1065, %v434_v8   ;;  %v466_v57 = vrot.slane %v436_v48, %v461_v45  ;;  %v512_v58 = vrot.slane %v435_v46, %v511_v47  ;;  %v611_v59 = vsub.s32 7, %v460_v42  ;;  %v516_v60 = vrot.slane %v436_v48, %v511_v47  ;;  %s336_s22 = sand.u32 1, %s1212_s28   ;;  %p1570_p12 = scmp.ne.s32.totalorder %s1562_s15, 0 }
  0x48   : > { %391 = vmatprep.subr.mxu0 %v349_v5  ;;  %v487_v61 = vrot.slane %v435_v46, %v486_v51  ;;  %v491_v62 = vrot.slane %v436_v48, %v486_v51  ;;  %vm452_vm1 = vcmp.lt.s32.totalorder %v1458_v49, 17  ;;  %v541_v2 = vrot.slane %v436_v48, %v536_v53  ;;  %s955_s24 = sshll.u32 %s336_s22, 5 }
  0x49   : > { %392 = vmatpush1.msra.mxu0 %v348_v6  ;;  %v562_v3 = vrot.slane %v435_v46, %v561_v54  ;;  %v566_v4 = vrot.slane %v436_v48, %v561_v54  ;;  %v587_v6 = vrot.slane %v435_v46, %v586_v56  ;;  %v591_v7 = vrot.slane %v436_v48, %v586_v56  ;;  %s338_s12 = scalar_lea.vmem [#allocation8], %s955_s24 }
  0x4a   : > { %958 = vmatmul.mubr.msk.f32.vlgmr.msra.gmra.mxu0 %vm357_vm0, %v350_v9  ;;  %1066 = vset.pattern.permute.xlu0 %v1231_v11  ;;  %vm477_vm2 = vcmp.lt.s32.totalorder %v1458_v49, 16  ;;  %v612_v10 = vrot.slane %v435_v46, %v611_v59  ;;  %vm502_vm3 = vcmp.lt.s32.totalorder %v1458_v49, 15  ;;  %vm527_vm4 = vcmp.lt.s32.totalorder %v1458_v49, 1  ;;  %s852_s13 = sshll.u32 %s338_s12, 4  ;;  %s1503_s13 = int_to_ptr.vmem [resolvable:$true] %s852_s13 }
  0x4b   : > { %817 = vmatprep.mubr.f32.mxu0 %v1227_v0  ;;  %506 = vperm.xlu0 %1066, %v434_v8   ;;  %vm552_vm5 = vcmp.lt.s32.totalorder %v1458_v49, 127  ;;  %vm577_vm6 = vcmp.lt.s32.totalorder %v1458_v49, 113  ;;  %vm602_vm7 = vcmp.lt.s32.totalorder %v1458_v49, 112  ;;  %vm627_vm8 = vcmp.lt.s32.totalorder %v1458_v49, 111  ;;  %v648_v49 = vld [vmem:[%s1556_s5] sm:$0xff] }
  0x4c   : > { %1073 = vset.pattern.permute.xlu1 %v1228_v1  ;;  %783 = vmatprep.subr.mxu0 %v345_v24 }
  0x4d   : > { %784 = vmatpush1.msra.mxu0 %v344_v25 }
  0x4e   : > { %963 = vmatmul.mubr.msk.f32.vlgmr.msra.gmra.mxu0 %vm357_vm0, %v745_v26 }
  0x4f   : > { %1067 = vset.pattern.permute.xlu0 %v1232_v12  ;;  %823 = vmatprep.mubr.f32.mxu0 %v1227_v0 }
  0x50   : > { %531 = vperm.xlu0 %1067, %v434_v8  }
  0x52   : > { %964 = vmatmul.mubr.msk.f32.gmra.mxu0 %vm357_vm0, %v746_v27 }
  0x54   : > { %1068 = vset.pattern.permute.xlu0 %v1233_v13  ;;  %v616_v13 = vrot.slane %v436_v48, %v611_v59 }
  0x55   : > { %556 = vperm.xlu0 %1068, %v434_v8  }
  0x59   : > { %1069 = vset.pattern.permute.xlu0 %v1234_v14 }
  0x5a   : > { %581 = vperm.xlu0 %1069, %v434_v8  }
  0x5e   : > { %1070 = vset.pattern.permute.xlu0 %v1235_v15 }
  0x5f   : > { %606 = vperm.xlu0 %1070, %v434_v8  }
  0x63   : > { %1071 = vset.pattern.permute.xlu0 %v1236_v16 }
  0x64   : > { %631 = vperm.xlu0 %1071, %v434_v8  }
  0x68   : > { %1072 = vset.pattern.permute.xlu0 %v1228_v1  ;;  %v537_v1 = vrot.slane %v435_v46, %v536_v53 }
  0xbd   : > { %v355_v17 = vpop.permute.xlu0 %354  ;;  %v1448_v30 = vpop.permute.xlu1 %441 }
  0xc1   : > { %v457_v34 = vpop.permute.xlu0 %456 }
  0xc2   : > { %v482_v31 = vpop.permute.xlu1 %481  ;;  %v467_v5 = vmul.f32 %v462_v55, %v457_v34  ;;  %v468_v9 = vmul.f32 %v466_v57, %v457_v34 }
  0xc3   : > { %v492_v14 = vmul.f32 %v487_v61, %v482_v31  ;;  %v493_v15 = vmul.f32 %v491_v62, %v482_v31 }
  0xc6   : > { %v507_v36 = vpop.permute.xlu0 %506 }
  0xcb   : > { %v532_v38 = vpop.permute.xlu0 %531 }
  0xcc   : > { %v543_v27 = vmul.f32 %v541_v2, %v532_v38 }
  0xd0   : > { %v1456_v43 = vpop.permute.xlu0 %556 }
  0xd5   : > { %v1460_v50 = vpop.permute.xlu0 %581 }
  0xda   : > { %v607_v8 = vpop.permute.xlu0 %606 }
  0xdb   : > { %v618_v61 = vmul.f32 %v616_v13, %v607_v8 }
 0x10a   : > { %v427_v18 = vpop.f32.mrf.mxu0 }
 0x10b   : > { %v428_v19 = vadd.f32 %v427_v18, %v355_v17  ;;  %v518_v18 = vmul.f32 %v516_v60, %v507_v36  ;;  %v617_v60 = vmul.f32 %v612_v10, %v607_v8 }
 0x10c   : > { %v429_v21 = vpop.f32.mrf.mxu0 }
 0x10d   : > { %v1405_v20 = vmax.f32 %v428_v19, 0.0  ;;  %v430_v22 = vadd.f32 %v429_v21, %v355_v17  ;;  %v517_v17 = vmul.f32 %v512_v58, %v507_v36  ;;  %v567_v36 = vmul.f32 %v562_v3, %v1456_v43  ;;  %v959_v3 = vld [vmem:[#allocation5 + $0x10] ss:$0 sm:$0xff] }
 0x10f   : > { %598 = vrot.lane.b32.xlu0 %v1405_v20, %s1237_s18  ;;  %446 = vrot.lane.b32.xlu1 %v1405_v20, %s1238_s21  ;;  %v1418_v23 = vmax.f32 %v430_v22, 0.0  ;;  %v542_v22 = vmul.f32 %v537_v1, %v532_v38  ;;  %v444_v26 = vmul.f32 %v1448_v30, %v1405_v20 }
 0x111   : > { %v445_v31 = vmul.f32 %v1448_v30, %v1418_v23  ;;  %v592_v30 = vmul.f32 %v587_v6, %v1460_v50 }
 0x113   : > { %623 = vrot.lane.b32.xlu0 %v1405_v20, %s1239_s23  ;;  %473 = vrot.lane.b32.xlu1 %v1405_v20, %s1240_s19 }
 0x117   : > { %498 = vrot.lane.b32.xlu1 %v1405_v20, %s1241_s25  ;;  %654 = vperm.xlu0 %1072, %v650_v28  }
 0x11b   : > { %523 = vrot.lane.b32.xlu1 %v1405_v20, %s1242_s26 }
 0x11f   : > { %548 = vrot.lane.b32.xlu1 %v1405_v20, %s1243_s17 }
 0x123   : > { %573 = vrot.lane.b32.xlu1 %v1405_v20, %s1244_s20 }
 0x127   : > { %448 = vrot.lane.b32.xlu1 %v1418_v23, %s1238_s21  ;;  %s971_s21 = sshll.u32 %s1313_s9, 9  ;;  %s1152_s9 = scalar_lea.vmem %s1503_s13, 512 }
 0x128   : > { %p1153_p10 = scmp.ne.s32.totalorder %s1503_s13, %s1152_s9 }
 0x12a   : > { %p1154_p2 = pnand %p1153_p10, %p1570_p12 }
 0x12b   : > { %475 = vrot.lane.b32.xlu1 %v1418_v23, %s1240_s19 }
 0x12c   : > { %p1155_p4 = pneg %p1154_p2 }
 0x12f   : > { %500 = vrot.lane.b32.xlu1 %v1418_v23, %s1241_s25 }
 0x133   : > { %525 = vrot.lane.b32.xlu1 %v1418_v23, %s1242_s26  ;;  %s1508_s26 = scalar_lea.hbm %s1559_s8, %s971_s21 }
 0x137   : > { %550 = vrot.lane.b32.xlu1 %v1418_v23, %s1243_s17 }
 0x13b   : > { %575 = vrot.lane.b32.xlu1 %v1418_v23, %s1244_s20 }
 0x13f   : > { %600 = vrot.lane.b32.xlu1 %v1418_v23, %s1237_s18  ;;  %s1510_s18 = scalar_lea.sflag [#allocation4], %s336_s22 }
 0x143   : > { %625 = vrot.lane.b32.xlu1 %v1418_v23, %s1239_s23  ;;  %v568_v23 = vmul.f32 %v566_v4, %v1456_v43  ;;  %v960_v4 = vld [vmem:[#allocation5 + $0x18] ss:$0 sm:$0xff]  ;;  %s1245_s23 = smov [#allocation8]  }
 0x144   : > { %s1156_s17 = sshll.u32 %s1245_s23, 4  ;;  %s1157_s17 = int_to_ptr.vmem [resolvable:$false] %s1156_s17 }
 0x145   : > { %s1158_s20 = scalar_lea.vmem %s1157_s17, 1024  ;;  %p1159_p7 = scmp.lt.s32.totalorder %s1503_s13, %s1157_s17 }
 0x146   : > { %p1160_p8 = scmp.lt.s32.totalorder %s1158_s20, %s1152_s9 }
 0x147   : > { %659 = vperm.xlu1 %1073, %v651_v29  }
 0x148   : > { %p1161_p11 = por %p1160_p8, %p1159_p7 }
 0x14a   : > { %p1162_p0 = pnand %p1161_p11, %p1155_p4 }
 0x181   : > { %v447_v32 = vpop.permute.xlu1 %446 }
 0x185   : > { %v474_v33 = vpop.permute.xlu1 %473 }
 0x189   : > { %v499_v35 = vpop.permute.xlu1 %498 }
 0x18d   : > { %v1450_v37 = vpop.permute.xlu1 %523 }
 0x191   : > { %v1452_v39 = vpop.permute.xlu1 %548 }
 0x195   : > { %v1454_v41 = vpop.permute.xlu1 %573 }
 0x199   : > { %v449_v44 = vpop.permute.xlu1 %448 }
 0x19a   : > { %v453_v11 = vsel %vm452_vm1, %v447_v32, %v449_v44  ;;  %v454_v12 = vsel %vm452_vm1, %v449_v44, %v447_v32  ;;  %v632_v32 = vpop.permute.xlu0 %631 }
 0x19b   : > { %v469_v24 = vmul.f32 %v467_v5, %v454_v12  ;;  %v470_v25 = vmul.f32 %v468_v9, %v453_v11  ;;  %v642_v8 = vmul.f32 %v959_v3, %v632_v32  ;;  %v643_v11 = vmul.f32 %v960_v4, %v632_v32 }
 0x19d   : > { %v476_v52 = vpop.permute.xlu1 %475  ;;  %v471_v20 = vadd.f32 %v469_v24, %v444_v26  ;;  %v472_v38 = vadd.f32 %v470_v25, %v445_v31  ;;  %v649_v26 = vld [vmem:[%s1556_s5 + $0x8] sm:$0xff] }
 0x19e   : > { %v478_v19 = vsel %vm477_vm2, %v474_v33, %v476_v52  ;;  %v479_v21 = vsel %vm477_vm2, %v476_v52, %v474_v33  ;;  %v599_v56 = vpop.permute.xlu0 %598 }
 0x19f   : > { %v494_v34 = vmul.f32 %v492_v14, %v479_v21  ;;  %v495_v40 = vmul.f32 %v493_v15, %v478_v19 }
 0x1a1   : > { %v501_v63 = vpop.permute.xlu1 %500  ;;  %v496_v48 = vadd.f32 %v494_v34, %v471_v20  ;;  %v497_v51 = vadd.f32 %v495_v40, %v472_v38 }
 0x1a2   : > { %v503_v28 = vsel %vm502_vm3, %v499_v35, %v501_v63  ;;  %v504_v29 = vsel %vm502_vm3, %v501_v63, %v499_v35  ;;  %v624_v12 = vpop.permute.xlu0 %623 }
 0x1a3   : > { %v519_v35 = vmul.f32 %v517_v17, %v504_v29  ;;  %v520_v45 = vmul.f32 %v518_v18, %v503_v28 }
 0x1a5   : > { %v526_v16 = vpop.permute.xlu1 %525  ;;  %v521_v57 = vadd.f32 %v519_v35, %v496_v48 }
 0x1a6   : > { %v528_v42 = vsel %vm527_vm4, %v1450_v37, %v526_v16  ;;  %v529_v44 = vsel %vm527_vm4, %v526_v16, %v1450_v37  ;;  %v593_v37 = vmul.f32 %v591_v7, %v1460_v50  ;;  %v655_v28 = vpop.permute.xlu0 %654 }
 0x1a7   : > { %v544_v52 = vmul.f32 %v542_v22, %v529_v44  ;;  %v545_v53 = vmul.f32 %v543_v27, %v528_v42  ;;  %v819_v27 = vpop.f32.mrf.mxu0 }
 0x1a9   : > { %v551_v33 = vpop.permute.xlu1 %550  ;;  %v546_v62 = vadd.f32 %v544_v52, %v521_v57  ;;  %v821_v31 = vpop.f32.mrf.mxu0 }
 0x1aa   : > { %v553_v46 = vsel %vm552_vm5, %v1452_v39, %v551_v33  ;;  %v554_v47 = vsel %vm552_vm5, %v551_v33, %v1452_v39  ;;  %v522_v39 = vadd.f32 %v520_v45, %v497_v51 }
 0x1ab   : > { %v569_v58 = vmul.f32 %v567_v36, %v553_v46  ;;  %v570_v59 = vmul.f32 %v568_v23, %v554_v47 }
 0x1ac   : > { %v547_v63 = vadd.f32 %v545_v53, %v522_v39 }
 0x1ad   : > { %v576_v54 = vpop.permute.xlu1 %575  ;;  %v571_v6 = vadd.f32 %v569_v58, %v546_v62 }
 0x1ae   : > { %v578_v55 = vsel %vm577_vm6, %v1454_v41, %v576_v54  ;;  %v579_v43 = vsel %vm577_vm6, %v576_v54, %v1454_v41  ;;  %v572_v7 = vadd.f32 %v570_v59, %v547_v63 }
 0x1af   : > { %v594_v50 = vmul.f32 %v592_v30, %v578_v55  ;;  %v595_v1 = vmul.f32 %v593_v37, %v579_v43 }
 0x1b1   : > { %v601_v2 = vpop.permute.xlu1 %600  ;;  %v596_v13 = vadd.f32 %v594_v50, %v571_v6  ;;  %v597_v15 = vadd.f32 %v595_v1, %v572_v7 }
 0x1b2   : > { %v603_v5 = vsel %vm602_vm7, %v599_v56, %v601_v2  ;;  %v604_v41 = vsel %vm602_vm7, %v601_v2, %v599_v56 }
 0x1b3   : > { %v619_v9 = vmul.f32 %v617_v60, %v603_v5  ;;  %v620_v10 = vmul.f32 %v618_v61, %v604_v41 }
 0x1b5   : > { %v626_v14 = vpop.permute.xlu1 %625  ;;  %v622_v19 = vadd.f32 %v620_v10, %v597_v15  ;;  %v621_v22 = vadd.f32 %v619_v9, %v596_v13 }
 0x1b6   : > { %v628_v16 = vsel %vm627_vm8, %v624_v12, %v626_v14  ;;  %v629_v17 = vsel %vm627_vm8, %v626_v14, %v624_v12 }
 0x1b7   : > { %v644_v18 = vmul.f32 %v642_v8, %v628_v16  ;;  %v645_v21 = vmul.f32 %v643_v11, %v629_v17 }
 0x1b9   : > { %v647_v24 = vadd.f32 %v645_v21, %v622_v19  ;;  %v646_v25 = vadd.f32 %v644_v18, %v621_v22 }
 0x1bb   : > { %698 = vmatprep.subr.mxu1 %v647_v24 }
 0x1bc   : > { %699 = vmatpush1.msra.mxu1 %v646_v25 }
 0x1bd   : > { %961 = vmatmul.mubr.msk.f32.vlgmr.msra.gmra.mxu1 %vm357_vm0, %v648_v49 }
 0x1be   : > { %738 = vmatprep.mubr.f32.mxu1 %v1227_v0  ;;  %v825_v0 = vpop.f32.mrf.mxu0 }
 0x1c0   : > { %v827_v23 = vpop.f32.mrf.mxu0 }
 0x1c1   : > { %962 = vmatmul.mubr.msk.f32.gmra.mxu1 %vm357_vm0, %v649_v26 }
 0x1c2   : > { %v660_v40 = vpop.permute.xlu1 %659 }
 0x27d   : > { %v734_v29 = vpop.f32.mrf.mxu1 }
 0x27e   : > { %v735_v32 = vadd.f32 %v734_v29, %v655_v28 }
 0x27f   : > { %v736_v34 = vpop.f32.mrf.mxu1 }
 0x280   : > { %v830_v33 = vadd.f32 %v819_v27, %v735_v32  ;;  %v737_v36 = vadd.f32 %v736_v34, %v655_v28 }
 0x281   : > { %v740_v42 = vpop.f32.mrf.mxu1 }
 0x282   : > { %834 = vst [vmem:[%s338_s12] sm:$0xff] %v830_v33  ;;  %v831_v44 = vadd.f32 %v821_v31, %v737_v36  ;;  %v741_v20 = vadd.f32 %v740_v42, %v660_v40 }
 0x283   : > { %v742_v38 = vpop.f32.mrf.mxu1 }
 0x284   : > { %835 = vst [vmem:[%s338_s12 + $0x8] sm:$0xff] %v831_v44  ;;  %v832_v35 = vadd.f32 %v825_v0, %v741_v20  ;;  %v743_v45 = vadd.f32 %v742_v38, %v660_v40 }
 0x286   : > { %836 = vst [vmem:[%s338_s12 + $0x10] sm:$0xff] %v832_v35  ;;  %v833_v30 = vadd.f32 %v827_v23, %v743_v45 }
 0x288   : > { %837 = vst [vmem:[%s338_s12 + $0x18] sm:$0xff] %v833_v30 }
 0x289   : > { %1165 = shalt.err (!%p1162_p0)
}
 0x28a   : > { %s1166_s22 = scalar_lea.hbm %s1508_s26, 512  ;;  %s1170_s21 = scalar_lea.hbm %s1559_s8, 1024 }
 0x28b   : > { %p1167_p6 = scmp.ne.s32.totalorder %s1508_s26, %s1166_s22  ;;  %p1171_p1 = scmp.lt.s32.totalorder %s1508_s26, %s1559_s8 }
 0x28c   : > { %p1172_p5 = scmp.lt.s32.totalorder %s1170_s21, %s1166_s22 }
 0x28d   : > { %p1168_p9 = pnand %p1167_p6, %p1570_p12 }
 0x28e   : > { %p1173_p3 = por %p1172_p5, %p1171_p1 }
 0x28f   : > { %p1169_p13 = pneg %p1168_p9 }
 0x291   : > { %p1174_p10 = pnand %p1173_p3, %p1169_p13 }
 0x293   : > { %1177 = shalt.err (!%p1174_p10)
}
 0x294   : > { %s1246_s9 = smov 256  }
 0x295   : > { %984 = dma.vmem_to_hbm [thread:$0]  (%p1570_p12), %s1503_s13, 512, %s1508_s26, %s1510_s18, %s1246_s9, %s1246_s9, %s1240_s19  }
 0x296 PF: > { %p1006_p2 = scmp.ge.s32.totalorder %s1220_s30, 2  ;;  %s867_s23 = sand.u32 1, %s1208_s27  }
 0x297   : > { %p1571_p4 = scmp.ne.s32.totalorder %s1563_s16, 0  ;;  %s868_s17 = scalar_lea.sflag [#allocation4], %s867_s23 }
 0x299   : > { %p997_p7 = pnand %p1006_p2, %p1571_p4 }
 0x29b   : > { %p998_p8 = pneg %p997_p7 }
 0x29d   : > { %1203 = dma.done.wait (%p998_p8), %s868_s17, 512  }
 0x29e   : > { %1205 = vsyncadd (%p998_p8), %s868_s17, 4294966784  ;;  %p20_p11 = scmp.ge.s32.totalorder %s1317_s11, 4   ;;  %s1572_s27 = smov %s1212_s28 }
 0x29f   : > { %s1573_s28 = smov %s1216_s29  ;;  %s1574_s29 = smov %s1328_s14 }
 0x2a0   : > { %s1575_s30 = smov %s1317_s11  ;;  %22 = sbr.rel (!%p20_p11) target bundleno = 5 (0x5), region = 100 }
 0x2a5   :  { %873 = vsyncpa [#allocation3], 1 }
 0x2a6   :  { %875 = vsyncpa [#allocation3 + $0x1], 1 }
 0x2a7   :  { %876 = vsyncpa [#allocation6], 1 }
 0x2a8   :  { %877 = vsyncpa [#allocation4], 1 }
 0x2a9   :  { %879 = vsyncpa [#allocation4 + $0x1], 1 }

</bundles_post_ra>
